<compile_context>
chip_gen: v6e
topology: v6e:2x2x1
jax: 0.10.0
libtpu: 0.0.40
codegen_flags: <defaults>
</compile_context>

<pallas_src>
import functools
import inspect

import numpy as np
import jax
import jax.numpy as jnp
from jax.experimental import pallas as pl
from jax.experimental.pallas import tpu as pltpu

try:
    _PIPELINE_MODE_OK = hasattr(pl, "Buffered") and (
        "pipeline_mode" in inspect.signature(pl.BlockSpec).parameters)
except (TypeError, ValueError):  # pragma: no cover
    _PIPELINE_MODE_OK = False


# --------------------------------------------------------------------------- #
# Kernels
# --------------------------------------------------------------------------- #
def _fused_kernel(x_ref, w_ref, gb_ref, o_ref, *, eps, slope, inv_n):
    """Single-pass Linear + BatchNorm1d + LeakyReLU for one out_dim tile."""
    # Linear (bias omitted: cancelled exactly by the BN mean subtraction).
    y = jnp.dot(x_ref[...], w_ref[...], preferred_element_type=jnp.float32)  # (N, tn)

    # BatchNorm1d (biased batch stats) folded into a per-feature scale/shift.
    # NOTE: E[y^2] - E[y]^2 in f32 with a clamp; switch to centered variance if
    # activations can have |mean| >> std.
    mean = jnp.sum(y, axis=0, keepdims=True) * inv_n
    sumsq = jnp.sum(y * y, axis=0, keepdims=True) * inv_n
    var = jnp.maximum(sumsq - mean * mean, 0.0)
    inv_std = jax.lax.rsqrt(var + eps)
    scale = gb_ref[0:1, :] * inv_std                  # gamma * inv_std
    shift = gb_ref[1:2, :] - mean * scale             # beta - mean * scale
    y = y * scale + shift

    # LeakyReLU(slope): max(y, slope*y) is exact for 0 < slope < 1.
    o_ref[...] = jnp.maximum(y, slope * y).astype(o_ref.dtype)


def _stats_kernel(x_ref, w_ref, sum_ref, sumsq_ref):
    """Two-phase pass 1: accumulate per-feature sum / sum-of-squares over N tiles."""
    @pl.when(pl.program_id(1) == 0)
    def _():
        sum_ref[...] = jnp.zeros_like(sum_ref)
        sumsq_ref[...] = jnp.zeros_like(sumsq_ref)

    y = jnp.dot(x_ref[...], w_ref[...], preferred_element_type=jnp.float32)
    sum_ref[...] += jnp.sum(y, axis=0, keepdims=True)
    sumsq_ref[...] += jnp.sum(y * y, axis=0, keepdims=True)


def _apply_kernel(x_ref, w_ref, ss_ref, o_ref, *, slope):
    """Two-phase pass 2: recompute the matmul tile, apply scale/shift + LeakyReLU."""
    y = jnp.dot(x_ref[...], w_ref[...], preferred_element_type=jnp.float32)
    y = y * ss_ref[0:1, :] + ss_ref[1:2, :]
    o_ref[...] = jnp.maximum(y, slope * y).astype(o_ref.dtype)


# --------------------------------------------------------------------------- #
# Tiling / VMEM planning
# --------------------------------------------------------------------------- #
def _round_up(x, m):
    return (x + m - 1) // m * m


def _tile_candidates(dim, unit):
    """Multiples of `unit` that divide `dim`, largest first; [dim] if none."""
    cands = [t for t in range(unit, dim + 1, unit) if dim % t == 0]
    return sorted(cands, reverse=True) if cands else [dim]


def _fused_bytes(n, in_dim, tile_n, mxu_b, out_b, *, single_x):
    return (n * in_dim * mxu_b * (1 if single_x else 2)   # x (ideally Buffered(1))
            + 2 * in_dim * tile_n * mxu_b                  # W tile (double-buffered)
            + 2 * 2 * tile_n * 4                           # packed gamma/beta tile
            + 2 * n * tile_n * out_b                       # output tile
            + 2 * n * tile_n * 4)                          # f32 y + epilogue temps


def _two_phase_bytes(tile_m, in_dim, tile_n, mxu_b, out_b):
    return (2 * tile_m * in_dim * mxu_b                    # x tile
            + 2 * in_dim * tile_n * mxu_b                  # W tile
            + 4 * 2 * tile_n * 4                           # stats / scale-shift slivers
            + 2 * tile_m * tile_n * out_b                  # output tile (pass 2)
            + 2 * tile_m * tile_n * 4)                     # f32 y temps


def _plan_fused(n, in_dim, out_dim_p, mxu_b, out_b, budget):
    for tn in _tile_candidates(out_dim_p, 128):
        if out_dim_p >= 256 and tn == out_dim_p:
            continue  # keep grid >= 2 so both v7x TensorCores get work ("parallel")
        need = _fused_bytes(n, in_dim, tn, mxu_b, out_b, single_x=True)
        if need <= budget:
            return tn, need
    return None, None


def _plan_two_phase(n, in_dim, out_dim_p, mxu_b, out_b, budget, tile_m, tile_n):
    tn_cands = [tile_n] if tile_n else _tile_candidates(out_dim_p, 128)
    tm_cands = [tile_m] if tile_m else _tile_candidates(n, 8)
    for tn in tn_cands:
        for tm in tm_cands:
            need = _two_phase_bytes(tm, in_dim, tn, mxu_b, out_b)
            if need <= budget:
                return tm, tn, need
    tm, tn = tm_cands[-1], tn_cands[-1]
    return tm, tn, _two_phase_bytes(tm, in_dim, tn, mxu_b, out_b)


def _vmem_limit(need, budget):
    # Sized from the buffer accounting (2x headroom for compiler temporaries),
    # clamped to the per-generation budget (<= ~48-56 MiB is safe on v7x; raise
    # vmem_budget_bytes toward 96-100 MiB on v5e / v6e for even bigger tiles).
    return int(max(32 * 2 ** 20, min(2 * need, max(budget, 32 * 2 ** 20))))


# --------------------------------------------------------------------------- #
# pallas_call wrappers
# --------------------------------------------------------------------------- #
def _run_fused(x_in, w_t, gb, n, in_dim, out_dim_p, tile_n, eps, slope, out_dtype,
               vmem_limit, single_buffer_x):
    x_kwargs = {}
    if single_buffer_x:
        # x's block index is constant across the grid: one buffer is enough.
        x_kwargs["pipeline_mode"] = pl.Buffered(buffer_count=1)
    kernel = functools.partial(_fused_kernel, eps=eps, slope=slope, inv_n=1.0 / n)
    return pl.pallas_call(
        kernel,
        out_shape=jax.ShapeDtypeStruct((n, out_dim_p), out_dtype),
        grid=(out_dim_p // tile_n,),
        in_specs=[
            pl.BlockSpec((n, in_dim), lambda j: (0, 0), **x_kwargs),  # x: fetched once
            pl.BlockSpec((in_dim, tile_n), lambda j: (0, j)),         # W^T tile
            pl.BlockSpec((2, tile_n), lambda j: (0, j)),              # packed gamma/beta
        ],
        out_specs=pl.BlockSpec((n, tile_n), lambda j: (0, j)),
        compiler_params=pltpu.CompilerParams(
            dimension_semantics=("parallel",),
            vmem_limit_bytes=vmem_limit),
    )(x_in, w_t, gb)


def _run_two_phase(x_in, w_t, gamma_f, beta_f, n, in_dim, out_dim_p, tile_m, tile_n,
                   eps, slope, out_dtype, vmem_limit):
    num_i = n // tile_m
    num_j = out_dim_p // tile_n

    # Pass 1: streaming per-feature sum / sum-of-squares.  The N-tile axis is the
    # last ("arbitrary") grid axis; the (1, tile_n) outputs stay resident across it.
    sums, sumsqs = pl.pallas_call(
        _stats_kernel,
        out_shape=(jax.ShapeDtypeStruct((1, out_dim_p), jnp.float32),
                   jax.ShapeDtypeStruct((1, out_dim_p), jnp.float32)),
        grid=(num_j, num_i),
        in_specs=[
            pl.BlockSpec((tile_m, in_dim), lambda j, i: (i, 0)),
            pl.BlockSpec((in_dim, tile_n), lambda j, i: (0, j)),  # constant over i
        ],
        out_specs=(pl.BlockSpec((1, tile_n), lambda j, i: (0, j)),
                   pl.BlockSpec((1, tile_n), lambda j, i: (0, j))),
        compiler_params=pltpu.CompilerParams(
            dimension_semantics=("parallel", "arbitrary"),
            vmem_limit_bytes=vmem_limit),
    )(x_in, w_t)

    # Fold batch stats + gamma/beta into per-feature scale/shift (parameter-sized
    # O(out_dim) work -> left to XLA on purpose).
    mean = sums / n
    var = jnp.maximum(sumsqs / n - mean * mean, 0.0)
    scale = gamma_f[None, :] * jax.lax.rsqrt(var + eps)
    shift = beta_f[None, :] - mean * scale
    ss = jnp.concatenate([scale, shift], axis=0).astype(jnp.float32)  # (2, out_dim_p)

    # Pass 2: recompute each (tile_m, tile_n) matmul tile and apply scale/shift +
    # LeakyReLU.  Fully parallel 2-D grid, bounded VMEM.
    return pl.pallas_call(
        functools.partial(_apply_kernel, slope=slope),
        out_shape=jax.ShapeDtypeStruct((n, out_dim_p), out_dtype),
        grid=(num_j, num_i),
        in_specs=[
            pl.BlockSpec((tile_m, in_dim), lambda j, i: (i, 0)),
            pl.BlockSpec((in_dim, tile_n), lambda j, i: (0, j)),
            pl.BlockSpec((2, tile_n), lambda j, i: (0, j)),
        ],
        out_specs=pl.BlockSpec((tile_m, tile_n), lambda j, i: (i, j)),
        compiler_params=pltpu.CompilerParams(
            dimension_semantics=("parallel", "parallel"),
            vmem_limit_bytes=vmem_limit),
    )(x_in, w_t, ss)


# --------------------------------------------------------------------------- #
# Public entry point
# --------------------------------------------------------------------------- #
def encoder_block(x, weight, bias, gamma, beta, *, eps=1e-5, slope=0.2,
                  mxu_dtype=jnp.bfloat16, out_dtype=jnp.float32,
                  tile_n=None, tile_m=None,
                  vmem_budget_bytes=48 * 1024 * 1024,
                  force_two_phase=False):
    """EncoderBlock forward: LeakyReLU(BatchNorm1d(Linear(x)), 0.2).

    x: (N, in_dim); weight: (out_dim, in_dim) (PyTorch nn.Linear layout).  `bias`
    is accepted for API parity but unused: BatchNorm's mean subtraction cancels any
    constant per-feature offset exactly, so the forward output is unchanged.
    """
    n, in_dim = x.shape
    out_dim, in_dim_w = weight.shape
    assert in_dim_w == in_dim
    del bias  # cancelled exactly by BN (forward output is numerically identical)

    mxu_b = np.dtype(mxu_dtype).itemsize
    out_b = np.dtype(out_dtype).itemsize

    # Pad out_dim up to a multiple of 128: lane-dense (unmasked) output stores, and
    # tiling even when out_dim % 128 != 0.  Padded features use W cols = 0, gamma = 1,
    # beta = 0 -> they produce exact zeros and are sliced off below.
    out_dim_p = _round_up(out_dim, 128)

    w_t = weight.T.astype(mxu_dtype)            # one-time (in_dim, out_dim) transpose
    gamma_f = jnp.asarray(gamma, jnp.float32).reshape(-1)
    beta_f = jnp.asarray(beta, jnp.float32).reshape(-1)
    if out_dim_p != out_dim:
        pad = out_dim_p - out_dim
        w_t = jnp.pad(w_t, ((0, 0), (0, pad)))
        gamma_f = jnp.pad(gamma_f, (0, pad), constant_values=1.0)
        beta_f = jnp.pad(beta_f, (0, pad))
    x_in = x.astype(mxu_dtype)

    if tile_n is not None:
        assert out_dim_p % tile_n == 0 and (tile_n % 128 == 0 or tile_n == out_dim_p)
    if tile_m is not None:
        assert n % tile_m == 0 and (tile_m % 8 == 0 or tile_m == n)

    # ---- Choose path & tiles (VMEM-budget driven) ----
    use_two_phase = force_two_phase
    tile_n_a = need_a = None
    if not use_two_phase:
        if tile_n is None:
            tile_n_a, need_a = _plan_fused(n, in_dim, out_dim_p, mxu_b, out_b,
                                           vmem_budget_bytes)
            use_two_phase = tile_n_a is None
        else:
            tile_n_a = tile_n
            need_a = _fused_bytes(n, in_dim, tile_n_a, mxu_b, out_b, single_x=True)
            use_two_phase = need_a > vmem_budget_bytes

    if use_two_phase:
        tm, tn, need_b = _plan_two_phase(n, in_dim, out_dim_p, mxu_b, out_b,
                                         vmem_budget_bytes, tile_m, tile_n)
        out_p = _run_two_phase(x_in, w_t, gamma_f, beta_f, n, in_dim, out_dim_p,
                               tm, tn, eps, slope, out_dtype,
                               _vmem_limit(need_b, vmem_budget_bytes))
    else:
        gb = jnp.stack([gamma_f, beta_f])                    # (2, out_dim_p) packed
        limit = _vmem_limit(need_a, vmem_budget_bytes)
        out_p = None
        if _PIPELINE_MODE_OK:
            try:
                out_p = _run_fused(x_in, w_t, gb, n, in_dim, out_dim_p, tile_n_a,
                                   eps, slope, out_dtype, limit, single_buffer_x=True)
            except Exception:
                # Runtime without Buffered(1) support: fall back to default buffering.
                out_p = None
        if out_p is None:
            out_p = _run_fused(x_in, w_t, gb, n, in_dim, out_dim_p, tile_n_a,
                               eps, slope, out_dtype, limit, single_buffer_x=False)

    return out_p[:, :out_dim] if out_dim_p != out_dim else out_p


# --------------------------------------------------------------------------- #
# Reference & test
# --------------------------------------------------------------------------- #
def encoder_block_ref(x, weight, bias, gamma, beta, *, eps=1e-5, slope=0.2):
    y = x @ weight.T + bias
    mean = y.mean(axis=0, keepdims=True)
    var = ((y - mean) ** 2).mean(axis=0, keepdims=True)
    y_bn = (y - mean) / jnp.sqrt(var + eps) * gamma + beta
    return jnp.where(y_bn >= 0.0, y_bn, slope * y_bn)


def _make_params(key, n, in_dim, out_dim):
    k_x, k_w, k_b, k_g, k_be = jax.random.split(key, 5)
    x = jax.random.normal(k_x, (n, in_dim), dtype=jnp.float32)
    bound = 1.0 / jnp.sqrt(in_dim)
    weight = jax.random.uniform(k_w, (out_dim, in_dim), minval=-bound, maxval=bound)
    bias = jax.random.uniform(k_b, (out_dim,), minval=-bound, maxval=bound)
    gamma = jnp.ones((out_dim,), jnp.float32) + 0.01 * jax.random.normal(k_g, (out_dim,))
    beta = 0.01 * jax.random.normal(k_be, (out_dim,))
    return x, weight, bias, gamma, beta


if __name__ == "__main__":
    key = jax.random.PRNGKey(0)
    k1, k2 = jax.random.split(key)

    # Case 1: module-like small shapes; out_dim=64 exercises padding to 128 (f32 MXU).
    N, IN_DIM, OUT_DIM = 8, 32, 64
    x, w, b, g, be = _make_params(k1, N, IN_DIM, OUT_DIM)
    out = jax.block_until_ready(encoder_block(x, w, b, g, be, mxu_dtype=jnp.float32))
    ref = encoder_block_ref(x, w, b, g, be)
    assert out.shape == (N, OUT_DIM)
    assert jnp.allclose(out, ref, atol=2e-4, rtol=2e-4)

    # Case 2: lane-dense 2-step "parallel" grid with default bf16 MXU inputs.
    N2, IN2, OUT2 = 16, 32, 256
    x2, w2, b2, g2, be2 = _make_params(k2, N2, IN2, OUT2)
    out2 = jax.block_until_ready(encoder_block(x2, w2, b2, g2, be2))
    ref2 = encoder_block_ref(x2, w2, b2, g2, be2)
    assert out2.shape == (N2, OUT2)
    assert jnp.allclose(out2, ref2, atol=1e-1, rtol=1e-1)

    # Case 3: bounded-VMEM two-phase (N-tiled) path, f32 MXU, tight tolerance.
    out3 = jax.block_until_ready(
        encoder_block(x2, w2, b2, g2, be2, mxu_dtype=jnp.float32,
                      force_two_phase=True, tile_m=8, tile_n=128))
    assert out3.shape == (N2, OUT2)
    assert jnp.allclose(out3, ref2, atol=2e-4, rtol=2e-4)

    print("KERNEL_OK")
</pallas_src>

<mosaic_0001>
module attributes {stable_mosaic.version = 11 : i64} {
  func.func @_fused_kernel(%arg0: i32, %arg1: memref<8x32xf32, #tpu.memory_space<vmem>>, %arg2: memref<32x128xf32, #tpu.memory_space<vmem>>, %arg3: memref<2x128xf32, #tpu.memory_space<vmem>>, %arg4: memref<8x128xf32, #tpu.memory_space<vmem>>) attributes {dimension_semantics = [#tpu.dimension_semantics<parallel>], iteration_bounds = array<i64: 1>, scalar_prefetch = 0 : i64, scratch_operands = 0 : i64, tpu.core_type = #tpu.core_type<tc>, window_params = [{pipeline_mode = #tpu.pipeline_mode<synchronous>, transform_indices = @transform_0, window_bounds = array<i64: 8, 32>}, {transform_indices = @transform_1, window_bounds = array<i64: 32, 128>}, {transform_indices = @transform_2, window_bounds = array<i64: 2, 128>}, {transform_indices = @transform_3, window_bounds = array<i64: 8, 128>}]} {
    %c0 = arith.constant 0 : index
    %c0_0 = arith.constant 0 : index
    %0 = vector.load %arg1[%c0, %c0_0] : memref<8x32xf32, #tpu.memory_space<vmem>>, vector<8x32xf32>
    %c0_1 = arith.constant 0 : index
    %c0_2 = arith.constant 0 : index
    %1 = vector.load %arg2[%c0_1, %c0_2] : memref<32x128xf32, #tpu.memory_space<vmem>>, vector<32x128xf32>
    %cst = arith.constant dense<0.000000e+00> : vector<8x128xf32>
    %2 = tpu.matmul %0, %1, %cst {dimension_numbers = #tpu.dot_dimension_numbers<[1], [0], [0], [1], [0, 0, 1, 1], [], []>} : vector<8x32xf32>, vector<32x128xf32>, vector<8x128xf32> -> vector<8x128xf32>
    %cst_3 = arith.constant dense<0.000000e+00> : vector<128xf32>
    %3 = vector.multi_reduction <add>, %2, %cst_3 [0] : vector<8x128xf32> to vector<128xf32>
    %4 = vector.shape_cast %3 : vector<128xf32> to vector<1x128xf32>
    %cst_4 = arith.constant 1.250000e-01 : f32
    %5 = vector.broadcast %cst_4 : f32 to vector<1x128xf32>
    %6 = arith.mulf %4, %5 : vector<1x128xf32>
    %7 = arith.mulf %2, %2 : vector<8x128xf32>
    %cst_5 = arith.constant dense<0.000000e+00> : vector<128xf32>
    %8 = vector.multi_reduction <add>, %7, %cst_5 [0] : vector<8x128xf32> to vector<128xf32>
    %9 = vector.shape_cast %8 : vector<128xf32> to vector<1x128xf32>
    %cst_6 = arith.constant 1.250000e-01 : f32
    %10 = vector.broadcast %cst_6 : f32 to vector<1x128xf32>
    %11 = arith.mulf %9, %10 : vector<1x128xf32>
    %12 = arith.mulf %6, %6 : vector<1x128xf32>
    %13 = arith.subf %11, %12 : vector<1x128xf32>
    %cst_7 = arith.constant 0.000000e+00 : f32
    %14 = vector.broadcast %cst_7 : f32 to vector<1x128xf32>
    %15 = arith.maximumf %13, %14 : vector<1x128xf32>
    %cst_8 = arith.constant 9.99999974E-6 : f32
    %16 = vector.broadcast %cst_8 : f32 to vector<1x128xf32>
    %17 = arith.addf %15, %16 : vector<1x128xf32>
    %18 = math.rsqrt %17 : vector<1x128xf32>
    %c0_9 = arith.constant 0 : index
    %c0_10 = arith.constant 0 : index
    %19 = vector.load %arg3[%c0_9, %c0_10] : memref<2x128xf32, #tpu.memory_space<vmem>>, vector<1x128xf32>
    %20 = arith.mulf %19, %18 : vector<1x128xf32>
    %c1 = arith.constant 1 : index
    %c0_11 = arith.constant 0 : index
    %21 = vector.load %arg3[%c1, %c0_11] : memref<2x128xf32, #tpu.memory_space<vmem>>, vector<1x128xf32>
    %22 = arith.mulf %6, %20 : vector<1x128xf32>
    %23 = arith.subf %21, %22 : vector<1x128xf32>
    %24 = vector.broadcast %20 : vector<1x128xf32> to vector<8x128xf32>
    %25 = arith.mulf %2, %24 : vector<8x128xf32>
    %26 = vector.broadcast %23 : vector<1x128xf32> to vector<8x128xf32>
    %27 = arith.addf %25, %26 : vector<8x128xf32>
    %cst_12 = arith.constant 2.000000e-01 : f32
    %28 = vector.broadcast %cst_12 : f32 to vector<8x128xf32>
    %29 = arith.mulf %28, %27 : vector<8x128xf32>
    %30 = arith.maximumf %27, %29 : vector<8x128xf32>
    %c0_13 = arith.constant 0 : index
    %c0_14 = arith.constant 0 : index
    %31 = vector.load %arg4[%c0_13, %c0_14] : memref<8x128xf32, #tpu.memory_space<vmem>>, vector<8x128xf32>
    tpu.vector_store %arg4[%c0_13, %c0_14], %30 {strides = array<i32>} : memref<8x128xf32, #tpu.memory_space<vmem>>, vector<8x128xf32>,
    return
  }
  func.func @transform_0(%arg0: i32) -> (i32, i32) {
    %c0_i32 = arith.constant 0 : i32
    %c0_i32_0 = arith.constant 0 : i32
    %c0_i32_1 = arith.constant 0 : i32
    return %c0_i32, %c0_i32_0 : i32, i32
  }
  func.func @transform_1(%arg0: i32) -> (i32, i32) {
    %c0_i32 = arith.constant 0 : i32
    %c0_i32_0 = arith.constant 0 : i32
    return %c0_i32, %arg0 : i32, i32
  }
  func.func @transform_2(%arg0: i32) -> (i32, i32) {
    %c0_i32 = arith.constant 0 : i32
    %c0_i32_0 = arith.constant 0 : i32
    return %c0_i32, %arg0 : i32, i32
  }
  func.func @transform_3(%arg0: i32) -> (i32, i32) {
    %c0_i32 = arith.constant 0 : i32
    %c0_i32_0 = arith.constant 0 : i32
    return %c0_i32, %arg0 : i32, i32
  }
}

module attributes {stable_mosaic.version = 11 : i64} {
  func.func @_fused_kernel(%arg0: i32, %arg1: memref<8x32xf32, #tpu.memory_space<vmem>>, %arg2: memref<32x128xf32, #tpu.memory_space<vmem>>, %arg3: memref<2x128xf32, #tpu.memory_space<vmem>>, %arg4: memref<8x128xf32, #tpu.memory_space<vmem>>) attributes {dimension_semantics = [#tpu.dimension_semantics<parallel>], iteration_bounds = array<i64: 1>, scalar_prefetch = 0 : i64, scratch_operands = 0 : i64, tpu.core_type = #tpu.core_type<tc>, window_params = [{pipeline_mode = #tpu.pipeline_mode<synchronous>, transform_indices = @transform_0, window_bounds = array<i64: 8, 32>}, {transform_indices = @transform_1, window_bounds = array<i64: 32, 128>}, {transform_indices = @transform_2, window_bounds = array<i64: 2, 128>}, {transform_indices = @transform_3, window_bounds = array<i64: 8, 128>}]} {
    %c0 = arith.constant 0 : index
    %c0_0 = arith.constant 0 : index
    %0 = vector.load %arg1[%c0, %c0_0] : memref<8x32xf32, #tpu.memory_space<vmem>>, vector<8x32xf32>
    %c0_1 = arith.constant 0 : index
    %c0_2 = arith.constant 0 : index
    %1 = vector.load %arg2[%c0_1, %c0_2] : memref<32x128xf32, #tpu.memory_space<vmem>>, vector<32x128xf32>
    %cst = arith.constant dense<0.000000e+00> : vector<8x128xf32>
    %2 = tpu.matmul %0, %1, %cst {dimension_numbers = #tpu.dot_dimension_numbers<[1], [0], [0], [1], [0, 0, 1, 1], [], []>} : vector<8x32xf32>, vector<32x128xf32>, vector<8x128xf32> -> vector<8x128xf32>
    %cst_3 = arith.constant dense<0.000000e+00> : vector<128xf32>
    %3 = vector.multi_reduction <add>, %2, %cst_3 [0] : vector<8x128xf32> to vector<128xf32>
    %4 = vector.shape_cast %3 : vector<128xf32> to vector<1x128xf32>
    %cst_4 = arith.constant 1.250000e-01 : f32
    %5 = vector.broadcast %cst_4 : f32 to vector<1x128xf32>
    %6 = arith.mulf %4, %5 : vector<1x128xf32>
    %7 = arith.mulf %2, %2 : vector<8x128xf32>
    %cst_5 = arith.constant dense<0.000000e+00> : vector<128xf32>
    %8 = vector.multi_reduction <add>, %7, %cst_5 [0] : vector<8x128xf32> to vector<128xf32>
    %9 = vector.shape_cast %8 : vector<128xf32> to vector<1x128xf32>
    %cst_6 = arith.constant 1.250000e-01 : f32
    %10 = vector.broadcast %cst_6 : f32 to vector<1x128xf32>
    %11 = arith.mulf %9, %10 : vector<1x128xf32>
    %12 = arith.mulf %6, %6 : vector<1x128xf32>
    %13 = arith.subf %11, %12 : vector<1x128xf32>
    %cst_7 = arith.constant 0.000000e+00 : f32
    %14 = vector.broadcast %cst_7 : f32 to vector<1x128xf32>
    %15 = arith.maximumf %13, %14 : vector<1x128xf32>
    %cst_8 = arith.constant 9.99999974E-6 : f32
    %16 = vector.broadcast %cst_8 : f32 to vector<1x128xf32>
    %17 = arith.addf %15, %16 : vector<1x128xf32>
    %18 = math.rsqrt %17 : vector<1x128xf32>
    %c0_9 = arith.constant 0 : index
    %c0_10 = arith.constant 0 : index
    %19 = vector.load %arg3[%c0_9, %c0_10] : memref<2x128xf32, #tpu.memory_space<vmem>>, vector<1x128xf32>
    %20 = arith.mulf %19, %18 : vector<1x128xf32>
    %c1 = arith.constant 1 : index
    %c0_11 = arith.constant 0 : index
    %21 = vector.load %arg3[%c1, %c0_11] : memref<2x128xf32, #tpu.memory_space<vmem>>, vector<1x128xf32>
    %22 = arith.mulf %6, %20 : vector<1x128xf32>
    %23 = arith.subf %21, %22 : vector<1x128xf32>
    %24 = vector.broadcast %20 : vector<1x128xf32> to vector<8x128xf32>
    %25 = arith.mulf %2, %24 : vector<8x128xf32>
    %26 = vector.broadcast %23 : vector<1x128xf32> to vector<8x128xf32>
    %27 = arith.addf %25, %26 : vector<8x128xf32>
    %cst_12 = arith.constant 2.000000e-01 : f32
    %28 = vector.broadcast %cst_12 : f32 to vector<8x128xf32>
    %29 = arith.mulf %28, %27 : vector<8x128xf32>
    %30 = arith.maximumf %27, %29 : vector<8x128xf32>
    %c0_13 = arith.constant 0 : index
    %c0_14 = arith.constant 0 : index
    %31 = vector.load %arg4[%c0_13, %c0_14] : memref<8x128xf32, #tpu.memory_space<vmem>>, vector<8x128xf32>
    tpu.vector_store %arg4[%c0_13, %c0_14], %30 {strides = array<i32>} : memref<8x128xf32, #tpu.memory_space<vmem>>, vector<8x128xf32>,
    return
  }
  func.func @transform_0(%arg0: i32) -> (i32, i32) {
    %c0_i32 = arith.constant 0 : i32
    %c0_i32_0 = arith.constant 0 : i32
    %c0_i32_1 = arith.constant 0 : i32
    return %c0_i32, %c0_i32_0 : i32, i32
  }
  func.func @transform_1(%arg0: i32) -> (i32, i32) {
    %c0_i32 = arith.constant 0 : i32
    %c0_i32_0 = arith.constant 0 : i32
    return %c0_i32, %arg0 : i32, i32
  }
  func.func @transform_2(%arg0: i32) -> (i32, i32) {
    %c0_i32 = arith.constant 0 : i32
    %c0_i32_0 = arith.constant 0 : i32
    return %c0_i32, %arg0 : i32, i32
  }
  func.func @transform_3(%arg0: i32) -> (i32, i32) {
    %c0_i32 = arith.constant 0 : i32
    %c0_i32_0 = arith.constant 0 : i32
    return %c0_i32, %arg0 : i32, i32
  }
}

</mosaic_0001>

<bundles_post_ra>
// kernel: tpu_custom_call.1
= control target key start
LH: loop header
LB: loop body
LE: loop exit
PB: predicated region body
PF: predicated region fallthrough
CT: control target
= control target key end

     0   :  { %8 = vsyncpa [#allocation3], 0  ;;  %s308_s0 = inlined_call_operand.hbm [shape: f32[8,32], index: 0, kind: input, shape index: {}]   ;;  %s309_s1 = inlined_call_operand.hbm [shape: f32[32,128], index: 1, kind: input, shape index: {}]   ;;  %s310_s2 = inlined_call_operand.vmem [shape: f32[2,128], index: 2, kind: input, shape index: {}]   ;;  %s311_s3 = inlined_call_operand.hbm [shape: f32[8,128], index: 3, kind: output, shape index: {}]  }
   0x1   :  { %9 = vsyncpa [#allocation6], 0 }
   0x2   :  { %10 = vsyncpa [#allocation4], 0  ;;  %s266_s12 = smov [#allocation2]   ;;  %s267_s14 = smov [#allocation5]  }
   0x3   :  { %s17_s13 = sshll.u32 %s266_s12, 4  ;;  %s26_s15 = sshll.u32 %s267_s14, 4  ;;  %s18_s13 = int_to_ptr.vmem [resolvable:$true] %s17_s13  ;;  %s27_s15 = int_to_ptr.vmem [resolvable:$true] %s26_s15 }
   0x4   :  { %s208_s16 = scalar_lea.vmem %s18_s13, 128  ;;  %p213_p1 = scmp.lt.s32.totalorder %s18_s13, %s18_s13 }
   0x5   :  { %p209_p0 = scmp.ne.s32.totalorder %s18_s13, %s208_s16  ;;  %p214_p2 = scmp.lt.s32.totalorder %s208_s16, %s208_s16 }
   0x7   :  { %p215_p3 = por %p214_p2, %p213_p1 }
   0x9   :  { %p216_p4 = pnand %p215_p3, %p209_p0 }
   0xb   :  { %219 = shalt.err (!%p216_p4)
}
   0xc   :  { %20 = dma.hbm_to_vmem [thread:$0]  %s308_s0, 128, %s18_s13, [#allocation3]  }
   0xd   :  { %s228_s19 = scalar_lea.vmem %s27_s15, 512  ;;  %p233_p6 = scmp.lt.s32.totalorder %s27_s15, %s27_s15 }
   0xe   :  { %p229_p5 = scmp.ne.s32.totalorder %s27_s15, %s228_s19  ;;  %p234_p7 = scmp.lt.s32.totalorder %s228_s19, %s228_s19 }
  0x10   :  { %p235_p8 = por %p234_p7, %p233_p6 }
  0x12   :  { %p236_p9 = pnand %p235_p8, %p229_p5 }
  0x14   :  { %239 = shalt.err (!%p236_p9)
}
  0x15   :  { %s268_s20 = smov 128   ;;  %s269_s21 = smov 8  }
  0x16   :  { %32 = dma.hbm_to_vmem [thread:$0]  %s309_s1, 512, %s27_s15, [#allocation6], %s268_s20, %s268_s20, %s269_s21  }
  0x17   :  { %260 = dma.done.wait [#allocation3], 128  }
  0x18   :  { %261 = vsyncadd [#allocation3], 4294967168 }
  0x19   :  { %262 = dma.done.wait [#allocation6], 512  }
  0x1a   :  { %263 = vsyncadd [#allocation6], 4294966784  ;;  %v270_v0 = vmov 0.0   ;;  %vm271_vm0 = vmmov 0   ;;  %v45_v1 = vld [vmem:[#allocation5 + $0x18] sm:$0xff]  ;;  %v44_v2 = vld [vmem:[#allocation5 + $0x10] sm:$0xff]  ;;  %v145_v27 = vlaneseq }
  0x1b   :  { %180 = vmatprep.subr.mxu0 %v270_v0  ;;  %188 = vmatprep.mubr.msk.f32.mxu0 %vm271_vm0, %v270_v0  ;;  %v43_v3 = vld [vmem:[#allocation5 + $0x8] sm:$0xff]  ;;  %v42_v4 = vld [vmem:[#allocation5] sm:$0xff]  ;;  %v41_v5 = vld [vmem:[#allocation2] sm:$0xff]  ;;  %vm46_vm1 = vcmask 261120   ;;  %s272_s26 = smov [#allocation7]  }
  0x1c   :  { %181 = vmatpush3.msra.mxu0 %v45_v1  ;;  %v146_v28 = vshrl.u32 %v145_v27, 7  ;;  %v140_v29 = vld [vmem:[%s310_s2] sm:$0x1]  ;;  %v142_v33 = vld [vmem:[%s310_s2 + $0x1] sm:$0x1]  ;;  %s164_s27 = sshll.u32 %s272_s26, 4  ;;  %s165_s27 = int_to_ptr.vmem [resolvable:$true] %s164_s27 }
  0x1d   :  { %182 = vmatprep.subr.mxu0 %v270_v0  ;;  %s240_s28 = scalar_lea.vmem %s165_s27, 128  ;;  %p245_p11 = scmp.lt.s32.totalorder %s165_s27, %s165_s27 }
  0x1e   :  { %183 = vmatpush3.msra.mxu0 %v44_v2  ;;  %v147_v30 = vsub.s32 0, %v146_v28  ;;  %p241_p10 = scmp.ne.s32.totalorder %s165_s27, %s240_s28  ;;  %p246_p12 = scmp.lt.s32.totalorder %s240_s28, %s240_s28 }
  0x1f   :  { %184 = vmatprep.subr.mxu0 %v270_v0 }
  0x20   :  { %185 = vmatpush3.msra.mxu0 %v43_v3  ;;  %p247_p13 = por %p246_p12, %p245_p11 }
  0x21   :  { %186 = vmatprep.subr.mxu0 %v270_v0 }
  0x22   :  { %187 = vmatpush3.msra.mxu0 %v42_v4  ;;  %p248_p0 = pnand %p247_p13, %p241_p10 }
  0x23   :  { %189 = vmatmul.mubr.msk.f32.vlgmr.msra.gmra.mxu0 %vm46_vm1, %v41_v5 }
  0xe3   :  { %v116_v6 = vpop.f32.mrf.mxu0 }
  0xe4   :  { %v120_v7 = vrot.slane %v116_v6, 4  ;;  %v127_v8 = vmul.f32 %v116_v6, %v116_v6 }
  0xe5   :  { %v190_v9 = vpop.f32.mrf.mxu0 }
  0xe6   :  { %v121_v10 = vadd.f32 %v120_v7, %v116_v6  ;;  %v128_v11 = vrot.slane %v127_v8, 4 }
  0xe8   :  { %v122_v12 = vrot.slane %v121_v10, 2  ;;  %v129_v13 = vadd.f32 %v128_v11, %v127_v8 }
  0xea   :  { %v123_v14 = vadd.f32 %v122_v12, %v121_v10  ;;  %v130_v15 = vrot.slane %v129_v13, 2 }
  0xec   :  { %v124_v16 = vrot.slane %v123_v14, 1  ;;  %v131_v17 = vadd.f32 %v130_v15, %v129_v13 }
  0xee   :  { %v125_v18 = vadd.f32 %v124_v16, %v123_v14  ;;  %v132_v19 = vrot.slane %v131_v17, 1 }
  0xf0   :  { %v126_v20 = vmul.f32 0.125, %v125_v18  ;;  %v133_v21 = vadd.f32 %v132_v19, %v131_v17 }
  0xf2   :  { %v134_v22 = vmul.f32 0.125, %v133_v21  ;;  %v135_v23 = vmul.f32 %v126_v20, %v126_v20 }
  0xf4   :  { %v136_v24 = vsub.f32 %v134_v22, %v135_v23 }
  0xf6   :  { %v137_v25 = vmax.f32 %v136_v24, 0.0 }
  0xf8   :  { %v138_v26 = vadd.f32 1e-05, %v137_v25 }
  0xfa   :  { %198 = vrsqrt.f32 %v138_v26 }
 0x107   :  { %v199_v31 = vpop.eup %198 }
 0x108   :  { %v141_v32 = vmul.f32 %v199_v31, %v140_v29 }
 0x10a   :  { %v148_v34 = vrot.slane %v141_v32, %v147_v30  ;;  %v143_v35 = vmul.f32 %v141_v32, %v126_v20 }
 0x10c   :  { %v144_v36 = vsub.f32 %v142_v33, %v143_v35  ;;  %v149_v37 = vmul.f32 %v148_v34, %v116_v6 }
 0x10e   :  { %v153_v38 = vrot.slane %v144_v36, %v147_v30 }
 0x110   :  { %v154_v39 = vadd.f32 %v153_v38, %v149_v37 }
 0x112   :  { %v155_v40 = vmul.f32 0.2, %v154_v39 }
 0x114   :  { %v156_v41 = vmax.f32 %v154_v39, %v155_v40 }
 0x116   :  { %157 = vst [vmem:[#allocation7] sm:$0xff] %v156_v41 }
 0x117   :  { %251 = shalt.err (!%p248_p0)
}
 0x118   :  { %167 = dma.vmem_to_hbm [thread:$0]  %s165_s27, 128, %s311_s3, [#allocation4]  }
 0x119   :  { %264 = dma.done.wait [#allocation4], 128  }
 0x11a   :  { %265 = vsyncadd [#allocation4], 4294967168 }
 0x11b   :  { %171 = vsyncpa [#allocation3], 1 }
 0x11c   :  { %172 = vsyncpa [#allocation6], 1 }
 0x11d   :  { %173 = vsyncpa [#allocation4], 1 }

// kernel: tpu_custom_call.1
= control target key start
LH: loop header
LB: loop body
LE: loop exit
PB: predicated region body
PF: predicated region fallthrough
CT: control target
= control target key end

     0   :  { %8 = vsyncpa [#allocation3], 0  ;;  %s308_s0 = inlined_call_operand.hbm [shape: f32[8,32], index: 0, kind: input, shape index: {}]   ;;  %s309_s1 = inlined_call_operand.hbm [shape: f32[32,128], index: 1, kind: input, shape index: {}]   ;;  %s310_s2 = inlined_call_operand.vmem [shape: f32[2,128], index: 2, kind: input, shape index: {}]   ;;  %s311_s3 = inlined_call_operand.hbm [shape: f32[8,128], index: 3, kind: output, shape index: {}]  }
   0x1   :  { %9 = vsyncpa [#allocation6], 0 }
   0x2   :  { %10 = vsyncpa [#allocation4], 0  ;;  %s266_s12 = smov [#allocation2]   ;;  %s267_s14 = smov [#allocation5]  }
   0x3   :  { %s17_s13 = sshll.u32 %s266_s12, 4  ;;  %s26_s15 = sshll.u32 %s267_s14, 4  ;;  %s18_s13 = int_to_ptr.vmem [resolvable:$true] %s17_s13  ;;  %s27_s15 = int_to_ptr.vmem [resolvable:$true] %s26_s15 }
   0x4   :  { %s208_s16 = scalar_lea.vmem %s18_s13, 128  ;;  %p213_p1 = scmp.lt.s32.totalorder %s18_s13, %s18_s13 }
   0x5   :  { %p209_p0 = scmp.ne.s32.totalorder %s18_s13, %s208_s16  ;;  %p214_p2 = scmp.lt.s32.totalorder %s208_s16, %s208_s16 }
   0x7   :  { %p215_p3 = por %p214_p2, %p213_p1 }
   0x9   :  { %p216_p4 = pnand %p215_p3, %p209_p0 }
   0xb   :  { %219 = shalt.err (!%p216_p4)
}
   0xc   :  { %20 = dma.hbm_to_vmem [thread:$0]  %s308_s0, 128, %s18_s13, [#allocation3]  }
   0xd   :  { %s228_s19 = scalar_lea.vmem %s27_s15, 512  ;;  %p233_p6 = scmp.lt.s32.totalorder %s27_s15, %s27_s15 }
   0xe   :  { %p229_p5 = scmp.ne.s32.totalorder %s27_s15, %s228_s19  ;;  %p234_p7 = scmp.lt.s32.totalorder %s228_s19, %s228_s19 }
  0x10   :  { %p235_p8 = por %p234_p7, %p233_p6 }
  0x12   :  { %p236_p9 = pnand %p235_p8, %p229_p5 }
  0x14   :  { %239 = shalt.err (!%p236_p9)
}
  0x15   :  { %s268_s20 = smov 128   ;;  %s269_s21 = smov 8  }
  0x16   :  { %32 = dma.hbm_to_vmem [thread:$0]  %s309_s1, 512, %s27_s15, [#allocation6], %s268_s20, %s268_s20, %s269_s21  }
  0x17   :  { %260 = dma.done.wait [#allocation3], 128  }
  0x18   :  { %261 = vsyncadd [#allocation3], 4294967168 }
  0x19   :  { %262 = dma.done.wait [#allocation6], 512  }
  0x1a   :  { %263 = vsyncadd [#allocation6], 4294966784  ;;  %v270_v0 = vmov 0.0   ;;  %vm271_vm0 = vmmov 0   ;;  %v45_v1 = vld [vmem:[#allocation5 + $0x18] sm:$0xff]  ;;  %v44_v2 = vld [vmem:[#allocation5 + $0x10] sm:$0xff]  ;;  %v145_v27 = vlaneseq }
  0x1b   :  { %180 = vmatprep.subr.mxu0 %v270_v0  ;;  %188 = vmatprep.mubr.msk.f32.mxu0 %vm271_vm0, %v270_v0  ;;  %v43_v3 = vld [vmem:[#allocation5 + $0x8] sm:$0xff]  ;;  %v42_v4 = vld [vmem:[#allocation5] sm:$0xff]  ;;  %v41_v5 = vld [vmem:[#allocation2] sm:$0xff]  ;;  %vm46_vm1 = vcmask 261120   ;;  %s272_s26 = smov [#allocation7]  }
  0x1c   :  { %181 = vmatpush3.msra.mxu0 %v45_v1  ;;  %v146_v28 = vshrl.u32 %v145_v27, 7  ;;  %v140_v29 = vld [vmem:[%s310_s2] sm:$0x1]  ;;  %v142_v33 = vld [vmem:[%s310_s2 + $0x1] sm:$0x1]  ;;  %s164_s27 = sshll.u32 %s272_s26, 4  ;;  %s165_s27 = int_to_ptr.vmem [resolvable:$true] %s164_s27 }
  0x1d   :  { %182 = vmatprep.subr.mxu0 %v270_v0  ;;  %s240_s28 = scalar_lea.vmem %s165_s27, 128  ;;  %p245_p11 = scmp.lt.s32.totalorder %s165_s27, %s165_s27 }
  0x1e   :  { %183 = vmatpush3.msra.mxu0 %v44_v2  ;;  %v147_v30 = vsub.s32 0, %v146_v28  ;;  %p241_p10 = scmp.ne.s32.totalorder %s165_s27, %s240_s28  ;;  %p246_p12 = scmp.lt.s32.totalorder %s240_s28, %s240_s28 }
  0x1f   :  { %184 = vmatprep.subr.mxu0 %v270_v0 }
  0x20   :  { %185 = vmatpush3.msra.mxu0 %v43_v3  ;;  %p247_p13 = por %p246_p12, %p245_p11 }
  0x21   :  { %186 = vmatprep.subr.mxu0 %v270_v0 }
  0x22   :  { %187 = vmatpush3.msra.mxu0 %v42_v4  ;;  %p248_p0 = pnand %p247_p13, %p241_p10 }
  0x23   :  { %189 = vmatmul.mubr.msk.f32.vlgmr.msra.gmra.mxu0 %vm46_vm1, %v41_v5 }
  0xe3   :  { %v116_v6 = vpop.f32.mrf.mxu0 }
  0xe4   :  { %v120_v7 = vrot.slane %v116_v6, 4  ;;  %v127_v8 = vmul.f32 %v116_v6, %v116_v6 }
  0xe5   :  { %v190_v9 = vpop.f32.mrf.mxu0 }
  0xe6   :  { %v121_v10 = vadd.f32 %v120_v7, %v116_v6  ;;  %v128_v11 = vrot.slane %v127_v8, 4 }
  0xe8   :  { %v122_v12 = vrot.slane %v121_v10, 2  ;;  %v129_v13 = vadd.f32 %v128_v11, %v127_v8 }
  0xea   :  { %v123_v14 = vadd.f32 %v122_v12, %v121_v10  ;;  %v130_v15 = vrot.slane %v129_v13, 2 }
  0xec   :  { %v124_v16 = vrot.slane %v123_v14, 1  ;;  %v131_v17 = vadd.f32 %v130_v15, %v129_v13 }
  0xee   :  { %v125_v18 = vadd.f32 %v124_v16, %v123_v14  ;;  %v132_v19 = vrot.slane %v131_v17, 1 }
  0xf0   :  { %v126_v20 = vmul.f32 0.125, %v125_v18  ;;  %v133_v21 = vadd.f32 %v132_v19, %v131_v17 }
  0xf2   :  { %v134_v22 = vmul.f32 0.125, %v133_v21  ;;  %v135_v23 = vmul.f32 %v126_v20, %v126_v20 }
  0xf4   :  { %v136_v24 = vsub.f32 %v134_v22, %v135_v23 }
  0xf6   :  { %v137_v25 = vmax.f32 %v136_v24, 0.0 }
  0xf8   :  { %v138_v26 = vadd.f32 1e-05, %v137_v25 }
  0xfa   :  { %198 = vrsqrt.f32 %v138_v26 }
 0x107   :  { %v199_v31 = vpop.eup %198 }
 0x108   :  { %v141_v32 = vmul.f32 %v199_v31, %v140_v29 }
 0x10a   :  { %v148_v34 = vrot.slane %v141_v32, %v147_v30  ;;  %v143_v35 = vmul.f32 %v141_v32, %v126_v20 }
 0x10c   :  { %v144_v36 = vsub.f32 %v142_v33, %v143_v35  ;;  %v149_v37 = vmul.f32 %v148_v34, %v116_v6 }
 0x10e   :  { %v153_v38 = vrot.slane %v144_v36, %v147_v30 }
 0x110   :  { %v154_v39 = vadd.f32 %v153_v38, %v149_v37 }
 0x112   :  { %v155_v40 = vmul.f32 0.2, %v154_v39 }
 0x114   :  { %v156_v41 = vmax.f32 %v154_v39, %v155_v40 }
 0x116   :  { %157 = vst [vmem:[#allocation7] sm:$0xff] %v156_v41 }
 0x117   :  { %251 = shalt.err (!%p248_p0)
}
 0x118   :  { %167 = dma.vmem_to_hbm [thread:$0]  %s165_s27, 128, %s311_s3, [#allocation4]  }
 0x119   :  { %264 = dma.done.wait [#allocation4], 128  }
 0x11a   :  { %265 = vsyncadd [#allocation4], 4294967168 }
 0x11b   :  { %171 = vsyncpa [#allocation3], 1 }
 0x11c   :  { %172 = vsyncpa [#allocation6], 1 }
 0x11d   :  { %173 = vsyncpa [#allocation4], 1 }

</bundles_post_ra>
